<compile_context>
chip_gen: v7x
topology: tpu7x:2x2x1
jax: 0.10.0
libtpu: 0.0.40
codegen_flags: <defaults>
</compile_context>

<pallas_src>
import functools
import math

import jax
import jax.numpy as jnp
from jax.experimental import pallas as pl
from jax.experimental.pallas import tpu as pltpu


def _round_up(x, m):
    return ((x + m - 1) // m) * m


def _pad_dim(d, base, tile):
    """Pad dim to `base` multiple, clamp tile to it, then pad to tile multiple."""
    dp = _round_up(d, base)
    t = min(tile, dp)
    return _round_up(dp, t), t


def _pad_cast_2d(x, rows, cols, dtype):
    """Zero-pad x to (rows, cols) and cast; no-op if already padded + cast."""
    dtype = jnp.dtype(dtype)
    if x.shape == (rows, cols) and x.dtype == dtype:
        return x
    return jnp.zeros((rows, cols), dtype).at[:x.shape[0], :x.shape[1]].set(
        x.astype(dtype))


@functools.lru_cache(maxsize=None)
def _gen_cfg():
    """Generation-aware tile presets and scoped-VMEM cap (bf16 operands)."""
    vmem_bytes = 128 * 1024 * 1024
    try:
        info = pltpu.get_tpu_info()
        vmem_bytes = int(getattr(info, "vmem_capacity_bytes", vmem_bytes))
    except Exception:
        pass
    if vmem_bytes <= 64 * 1024 * 1024:
        # v7x-like: 64 MiB physical VMEM per TC -> tiles <= 512, cap at 48 MiB.
        return {"tm": 512, "tn": 512, "tk": 512, "vmem_cap": 48 * 1024 * 1024}
    # v5e / v6e: 128 MiB VMEM -> larger K tiles amortize per-step overhead and
    # accumulator read-modify-write traffic per MXU flop.
    return {"tm": 512, "tn": 512, "tk": 1024, "vmem_cap": 96 * 1024 * 1024}


# --------------------------------------------------------------------------
# Kernels
# --------------------------------------------------------------------------
def _mm_small_rhs_kernel(x_ref, w_ref, b_ref, o_ref, *, apply_relu):
    # Whole weight + bias resident; 1-D grid over M; no reduction axis.
    out = jnp.dot(x_ref[...], w_ref[...],
                  preferred_element_type=jnp.float32) + b_ref[...]
    if apply_relu:
        out = jnp.maximum(out, 0.0)
    o_ref[...] = out.astype(o_ref.dtype)


def _mm_kernel_f32out(mask_ref, x_ref, w_ref, b_ref, o_ref, *, apply_relu):
    # f32 output block doubles as the accumulator (resident across k axis).
    i, k = pl.program_id(0), pl.program_id(2)

    @pl.when(k == 0)
    def _():
        o_ref[...] = jnp.zeros_like(o_ref)

    @pl.when(mask_ref[i, k] != 0)      # skip MXU work for all-zero A tiles
    def _():
        o_ref[...] += jnp.dot(x_ref[...], w_ref[...],
                              preferred_element_type=jnp.float32)

    @pl.when(k == pl.num_programs(2) - 1)
    def _():
        out = o_ref[...] + b_ref[...]
        if apply_relu:
            out = jnp.maximum(out, 0.0)
        o_ref[...] = out


def _mm_kernel_scratch(mask_ref, x_ref, w_ref, b_ref, o_ref, acc_ref, *,
                       apply_relu):
    # Narrow (bf16) output: accumulate in an f32 VMEM scratch, cast at the end.
    i, k = pl.program_id(0), pl.program_id(2)

    @pl.when(k == 0)
    def _():
        acc_ref[...] = jnp.zeros_like(acc_ref)

    @pl.when(mask_ref[i, k] != 0)
    def _():
        acc_ref[...] += jnp.dot(x_ref[...], w_ref[...],
                                preferred_element_type=jnp.float32)

    @pl.when(k == pl.num_programs(2) - 1)
    def _():
        out = acc_ref[...] + b_ref[...]
        if apply_relu:
            out = jnp.maximum(out, 0.0)
        o_ref[...] = out.astype(o_ref.dtype)


# --------------------------------------------------------------------------
# Wrapper
# --------------------------------------------------------------------------
def matmul_bias_act(a, b, bias=None, *, apply_relu=False,
                    out_dtype=jnp.float32, compute_dtype=jnp.bfloat16,
                    a_block_mask=None, tm=None, tn=None, tk=None):
    """out = act(a @ b + bias); bf16 MXU operands, f32 accumulation/epilogue."""
    cfg = _gen_cfg()
    tm = cfg["tm"] if tm is None else tm
    tn = cfg["tn"] if tn is None else tn
    tk = cfg["tk"] if tk is None else tk

    M, K = a.shape
    K2, N = b.shape
    assert K == K2, (a.shape, b.shape)
    compute_dtype = jnp.dtype(compute_dtype)
    out_dtype = jnp.dtype(out_dtype)
    cd_itm = compute_dtype.itemsize
    out_itm = out_dtype.itemsize
    sub = 16 if cd_itm < 4 else 8   # sublane-safe padding for packed dtypes

    Mp, tm = _pad_dim(M, sub, tm)
    Kp, tk = _pad_dim(K, 128, tk)
    Np, tn = _pad_dim(N, 128, tn)

    a_p = _pad_cast_2d(a, Mp, Kp, compute_dtype)
    b_p = _pad_cast_2d(b, Kp, Np, compute_dtype)
    if bias is None:
        bias_p = jnp.zeros((1, Np), jnp.float32)
    else:
        bias_p = jnp.zeros((1, Np), jnp.float32).at[0, :N].set(
            bias.astype(jnp.float32))

    cap = cfg["vmem_cap"]

    # ---- Fast path: small RHS (the GCN feature transform x @ W). ----
    if a_block_mask is None and Kp * Np * cd_itm <= 2 * 1024 * 1024:
        grid = (Mp // tm,)
        fast_bytes = (2 * tm * Kp * cd_itm + 2 * Kp * Np * cd_itm
                      + 2 * tm * Np * out_itm + 2 * Np * 4)
        vmem_limit = int(min(max(2 * fast_bytes, 16 * 1024 * 1024), cap))
        cost = pl.CostEstimate(
            flops=2 * Mp * Kp * Np, transcendentals=0,
            bytes_accessed=cd_itm * (Mp * Kp + Kp * Np)
            + out_itm * Mp * Np + 4 * Np)
        out_p = pl.pallas_call(
            functools.partial(_mm_small_rhs_kernel, apply_relu=apply_relu),
            out_shape=jax.ShapeDtypeStruct((Mp, Np), out_dtype),
            grid_spec=pltpu.PrefetchScalarGridSpec(
                num_scalar_prefetch=0,
                grid=grid,
                in_specs=[
                    pl.BlockSpec((tm, Kp), lambda i: (i, 0)),
                    pl.BlockSpec((Kp, Np), lambda i: (0, 0)),
                    pl.BlockSpec((1, Np), lambda i: (0, 0)),
                ],
                out_specs=pl.BlockSpec((tm, Np), lambda i: (i, 0)),
            ),
            compiler_params=pltpu.CompilerParams(
                dimension_semantics=("parallel",),
                vmem_limit_bytes=vmem_limit),
            cost_estimate=cost,
        )(a_p, b_p, bias_p)
        return out_p if (Mp, Np) == (M, N) else out_p[:M, :N]

    # ---- General tiled path: (M//tm, N//tn, K//tk) grid, k-last reduction. ----
    grid = (Mp // tm, Np // tn, Kp // tk)
    if a_block_mask is None:
        mask = jnp.ones((grid[0], grid[2]), jnp.int32)
    else:
        mask = a_block_mask.astype(jnp.int32)
        assert mask.shape == (grid[0], grid[2]), (mask.shape, grid)

    acc_in_out = out_dtype == jnp.float32
    kernel = _mm_kernel_f32out if acc_in_out else _mm_kernel_scratch
    scratch = [] if acc_in_out else [pltpu.VMEM((tm, tn), jnp.float32)]

    tile_bytes = (2 * (tm * tk + tk * tn) * cd_itm       # double-buffered inputs
                  + 2 * tm * tn * out_itm                # output blocks
                  + (0 if acc_in_out else tm * tn * 4)   # f32 accumulator
                  + 4 * tn * 4)                          # bias
    vmem_limit = int(min(max(2 * tile_bytes, 16 * 1024 * 1024), cap))

    # bytes_accessed includes the re-streaming factors (A per N tile, B per M tile).
    cost = pl.CostEstimate(
        flops=2 * Mp * Kp * Np, transcendentals=0,
        bytes_accessed=cd_itm * (Mp * Kp * (Np // tn) + Kp * Np * (Mp // tm))
        + out_itm * Mp * Np + 4 * Np)

    out_p = pl.pallas_call(
        functools.partial(kernel, apply_relu=apply_relu),
        out_shape=jax.ShapeDtypeStruct((Mp, Np), out_dtype),
        grid_spec=pltpu.PrefetchScalarGridSpec(
            num_scalar_prefetch=1,
            grid=grid,
            in_specs=[
                pl.BlockSpec((tm, tk), lambda i, j, k, m: (i, k)),
                pl.BlockSpec((tk, tn), lambda i, j, k, m: (k, j)),
                pl.BlockSpec((1, tn), lambda i, j, k, m: (0, j)),
            ],
            out_specs=pl.BlockSpec((tm, tn), lambda i, j, k, m: (i, j)),
            scratch_shapes=scratch,
        ),
        compiler_params=pltpu.CompilerParams(
            dimension_semantics=("parallel", "parallel", "arbitrary"),
            vmem_limit_bytes=vmem_limit),
        cost_estimate=cost,
    )(mask, a_p, b_p, bias_p)

    return out_p if (Mp, Np) == (M, N) else out_p[:M, :N]


# --------------------------------------------------------------------------
# GCN model (dense normalized adjacency, PyG GCNConv semantics)
# --------------------------------------------------------------------------
def build_norm_adj(edge_index, num_nodes, dtype=jnp.float32):
    """Dense D^{-1/2}(A+I)D^{-1/2}; messages flow src -> dst (PyG convention).
    Note: duplicate edges are collapsed to weight 1 (test graph has none)."""
    src, dst = edge_index[0], edge_index[1]
    adj = jnp.zeros((num_nodes, num_nodes), dtype).at[dst, src].set(1.0)
    adj = jnp.maximum(adj, jnp.eye(num_nodes, dtype=dtype))  # self loops
    deg = adj.sum(axis=1)
    d_inv_sqrt = jnp.where(deg > 0, 1.0 / jnp.sqrt(deg), 0.0)
    return adj * d_inv_sqrt[:, None] * d_inv_sqrt[None, :]


def glorot(key, fan_in, fan_out, dtype=jnp.float32):
    limit = math.sqrt(6.0 / (fan_in + fan_out))
    return jax.random.uniform(key, (fan_in, fan_out),
                              minval=-limit, maxval=limit, dtype=dtype)


def init_gcn_params(key, input_dim, layer_num=2, hidden=128,
                    dtype=jnp.float32):
    # Weights stored as (in_features, out_features): no transpose needed.
    dims = []
    if layer_num > 1:
        dims.append((input_dim, hidden * 2))
        for _ in range(layer_num - 2):
            dims.append((hidden * 2, hidden * 2))
        dims.append((hidden * 2, hidden))
    else:
        dims.append((input_dim, hidden))
    keys = jax.random.split(key, 2 * len(dims))
    weights = [glorot(keys[2 * i], fi, fo, dtype)
               for i, (fi, fo) in enumerate(dims)]
    # Small non-zero biases to exercise the fused bias path (PyG inits to 0).
    biases = [0.01 * jax.random.normal(keys[2 * i + 1], (fo,), dtype=dtype)
              for i, (_, fo) in enumerate(dims)]
    return weights, biases


def gcn_forward(x, edge_index, weights, biases, *, compute_dtype=jnp.bfloat16):
    """Pallas GCN forward: x = relu(A_norm @ (x @ W_l) + b_l) per layer."""
    n = x.shape[0]
    cfg = _gen_cfg()
    compute_dtype = jnp.dtype(compute_dtype)
    sub = 16 if compute_dtype.itemsize < 4 else 8

    adj = build_norm_adj(edge_index, n, dtype=jnp.float32)

    # Pad + cast the adjacency to bf16 ONCE (it is the A operand of every
    # aggregation matmul) and precompute its nonzero-block mask so the kernel
    # can skip the MXU dot on all-zero tiles.
    Mp_adj, tm_a = _pad_dim(n, sub, cfg["tm"])
    Kp_adj, tk_a = _pad_dim(n, 128, cfg["tk"])
    adj_p = _pad_cast_2d(adj, Mp_adj, Kp_adj, compute_dtype)
    gm, gk = Mp_adj // tm_a, Kp_adj // tk_a
    adj_mask = jnp.any(adj_p.reshape(gm, tm_a, gk, tk_a) != 0,
                       axis=(1, 3)).astype(jnp.int32)

    for w, b in zip(weights, biases):
        # Feature transform H = x @ W (fast path), emitted directly in bf16 so
        # the aggregation matmul streams half the HBM bytes.
        h = matmul_bias_act(x, w, out_dtype=compute_dtype,
                            compute_dtype=compute_dtype)
        # Pad H's rows to the adjacency's K padding (zero rows are inert).
        h_p = _pad_cast_2d(h, Kp_adj, h.shape[1], compute_dtype)
        # Aggregation + bias + ReLU: x = relu(A_norm @ H + b), f32 output.
        x = matmul_bias_act(adj_p, h_p, bias=b, apply_relu=True,
                            out_dtype=jnp.float32,
                            compute_dtype=compute_dtype,
                            a_block_mask=adj_mask,
                            tm=cfg["tm"], tn=cfg["tn"], tk=cfg["tk"])
        x = x[:n]
    return x


def gcn_ref(x, edge_index, weights, biases, compute_dtype=jnp.bfloat16):
    """Pure-JAX reference with matched bf16 casts + f32 accumulation."""
    cd = jnp.dtype(compute_dtype)
    adj = build_norm_adj(edge_index, x.shape[0], dtype=jnp.float32).astype(cd)
    for w, b in zip(weights, biases):
        h = jnp.dot(x.astype(cd), w.astype(cd),
                    preferred_element_type=jnp.float32).astype(cd)
        x = jax.nn.relu(jnp.dot(adj, h, preferred_element_type=jnp.float32)
                        + b.astype(jnp.float32))
    return x


if __name__ == "__main__":
    key = jax.random.PRNGKey(0)
    k_x, k_e, k_p = jax.random.split(key, 3)

    num_nodes = 64
    input_dim = 32
    layer_num = 2
    hidden = 64            # layer widths: 32 -> 128 -> 64

    # Deterministic small graph: ring edges + a few extra pseudo-random edges.
    ring_src = jnp.arange(num_nodes, dtype=jnp.int32)
    ring_dst = (ring_src + 1) % num_nodes
    extra_src = jax.random.randint(k_e, (32,), 0, num_nodes, dtype=jnp.int32)
    extra_dst = (extra_src + 7) % num_nodes
    edge_index = jnp.stack([
        jnp.concatenate([ring_src, extra_src]),
        jnp.concatenate([ring_dst, extra_dst]),
    ])

    x = jax.random.normal(k_x, (num_nodes, input_dim), dtype=jnp.float32)
    weights, biases = init_gcn_params(k_p, input_dim, layer_num, hidden)

    out = gcn_forward(x, edge_index, weights, biases)
    out = jax.block_until_ready(out)

    ref = gcn_ref(x, edge_index, weights, biases)
    assert out.shape == (num_nodes, hidden), out.shape
    err = float(jnp.max(jnp.abs(out - ref)))
    assert err < 1e-2, err

    print("KERNEL_OK")
</pallas_src>

<mosaic_0001>
module attributes {stable_mosaic.version = 11 : i64} {
  func.func @_mm_small_rhs_kernel(%arg0: i32, %arg1: memref<64x128xbf16, #tpu.memory_space<vmem>>, %arg2: memref<128x128xbf16, #tpu.memory_space<vmem>>, %arg3: memref<1x128xf32, #tpu.memory_space<vmem>>, %arg4: memref<64x128xbf16, #tpu.memory_space<vmem>>) attributes {dimension_semantics = [#tpu.dimension_semantics<parallel>], iteration_bounds = array<i64: 1>, scalar_prefetch = 0 : i64, scratch_operands = 0 : i64, tpu.core_type = #tpu.core_type<tc>, window_params = [{transform_indices = @transform_0, window_bounds = array<i64: 64, 128>}, {pipeline_mode = #tpu.pipeline_mode<synchronous>, transform_indices = @transform_1, window_bounds = array<i64: 128, 128>}, {pipeline_mode = #tpu.pipeline_mode<synchronous>, transform_indices = @transform_2, window_bounds = array<i64: 1, 128>}, {transform_indices = @transform_3, window_bounds = array<i64: 64, 128>}]} {
    %c0 = arith.constant 0 : index
    %c0_0 = arith.constant 0 : index
    %0 = vector.load %arg1[%c0, %c0_0] : memref<64x128xbf16, #tpu.memory_space<vmem>>, vector<64x128xbf16>
    %c0_1 = arith.constant 0 : index
    %c0_2 = arith.constant 0 : index
    %1 = vector.load %arg2[%c0_1, %c0_2] : memref<128x128xbf16, #tpu.memory_space<vmem>>, vector<128x128xbf16>
    %cst = arith.constant dense<0.000000e+00> : vector<64x128xf32>
    %2 = tpu.matmul %0, %1, %cst {dimension_numbers = #tpu.dot_dimension_numbers<[1], [0], [0], [1], [0, 0, 1, 1], [], []>} : vector<64x128xbf16>, vector<128x128xbf16>, vector<64x128xf32> -> vector<64x128xf32>
    %c0_3 = arith.constant 0 : index
    %c0_4 = arith.constant 0 : index
    %3 = vector.load %arg3[%c0_3, %c0_4] : memref<1x128xf32, #tpu.memory_space<vmem>>, vector<1x128xf32>
    %4 = vector.broadcast %3 : vector<1x128xf32> to vector<64x128xf32>
    %5 = arith.addf %2, %4 : vector<64x128xf32>
    %6 = arith.truncf %5 : vector<64x128xf32> to vector<64x128xbf16>
    %c0_5 = arith.constant 0 : index
    %c0_6 = arith.constant 0 : index
    %7 = vector.load %arg4[%c0_5, %c0_6] : memref<64x128xbf16, #tpu.memory_space<vmem>>, vector<64x128xbf16>
    tpu.vector_store %arg4[%c0_5, %c0_6], %6 {strides = array<i32>} : memref<64x128xbf16, #tpu.memory_space<vmem>>, vector<64x128xbf16>,
    return
  }
  func.func @transform_0(%arg0: i32) -> (i32, i32) {
    %c0_i32 = arith.constant 0 : i32
    %c0_i32_0 = arith.constant 0 : i32
    return %arg0, %c0_i32 : i32, i32
  }
  func.func @transform_1(%arg0: i32) -> (i32, i32) {
    %c0_i32 = arith.constant 0 : i32
    %c0_i32_0 = arith.constant 0 : i32
    %c0_i32_1 = arith.constant 0 : i32
    return %c0_i32, %c0_i32_0 : i32, i32
  }
  func.func @transform_2(%arg0: i32) -> (i32, i32) {
    %c0_i32 = arith.constant 0 : i32
    %c0_i32_0 = arith.constant 0 : i32
    %c0_i32_1 = arith.constant 0 : i32
    return %c0_i32, %c0_i32_0 : i32, i32
  }
  func.func @transform_3(%arg0: i32) -> (i32, i32) {
    %c0_i32 = arith.constant 0 : i32
    %c0_i32_0 = arith.constant 0 : i32
    return %arg0, %c0_i32 : i32, i32
  }
}

</mosaic_0001>

<bundles_post_ra>
// kernel: tpu_custom_call.1
= control target key start
LH: loop header
LB: loop body
LE: loop exit
PB: predicated region body
PF: predicated region fallthrough
CT: control target
= control target key end

     0   :  { %8 = vsyncpa [#allocation3], 0  ;;  %s536_s0 = inlined_call_operand.hbm [shape: bf16[64,128], index: 0, kind: input, shape index: {}]   ;;  %s537_s1 = inlined_call_operand.hbm [shape: bf16[128,128], index: 1, kind: input, shape index: {}]   ;;  %s538_s2 = inlined_call_operand.vmem [shape: f32[1,128], index: 2, kind: input, shape index: {}]   ;;  %s539_s3 = inlined_call_operand.hbm [shape: bf16[64,128], index: 3, kind: output, shape index: {}]  }
   0x1   :  { %9 = vsyncpa [#allocation6], 0 }
   0x2   :  { %10 = vsyncpa [#allocation4], 0  ;;  %s463_s12 = smov [#allocation2]   ;;  %s391_s16 = scalar_lea.hbm %s536_s0, 512 }
   0x3   :  { %s16_s13 = sshll.u32 %s463_s12, 4  ;;  %p392_p0 = scmp.ne.s32.totalorder %s536_s0, %s391_s16  ;;  %s17_s13 = int_to_ptr.vmem [resolvable:$true] %s16_s13 }
   0x4   :  { %p395_p1 = scmp.lt.u32.totalorder %s391_s16, %s536_s0 }
   0x6   :  { %p397_p2 = pnand %p395_p1, %p392_p0 }
   0x8   :  { %400 = shalt.err (!%p397_p2)
}
   0x9   :  { %s401_s21 = scalar_lea.vmem %s17_s13, 512  ;;  %p406_p4 = scmp.lt.s32.totalorder %s17_s13, %s17_s13 }
   0xa   :  { %p402_p3 = scmp.ne.s32.totalorder %s17_s13, %s401_s21  ;;  %p407_p5 = scmp.lt.s32.totalorder %s401_s21, %s401_s21 }
   0xc   :  { %p408_p6 = por %p407_p5, %p406_p4 }
   0xe   :  { %p409_p7 = pnand %p408_p6, %p402_p3 }
  0x10   :  { %412 = shalt.err (!%p409_p7)
}
  0x11   :  { %s464_s22 = smov 64   ;;  %s465_s23 = smov 4  }
  0x12   :  { %22 = dma.hbm_to_vmem [thread:$0]  %s536_s0, 512, %s17_s13, [#allocation3], %s464_s22, %s464_s22, %s465_s23  }
  0x13   :  { %s466_s26 = smov [#allocation5]   ;;  %s413_s30 = scalar_lea.hbm %s537_s1, 1024 }
  0x14   :  { %s28_s27 = sshll.u32 %s466_s26, 4  ;;  %p414_p8 = scmp.ne.s32.totalorder %s537_s1, %s413_s30  ;;  %s29_s27 = int_to_ptr.vmem [resolvable:$true] %s28_s27 }
  0x15   :  { %p417_p9 = scmp.lt.u32.totalorder %s413_s30, %s537_s1 }
  0x17   :  { %p419_p10 = pnand %p417_p9, %p414_p8 }
  0x19   :  { %422 = shalt.err (!%p419_p10)
}
  0x1a   :  { %s423_s8 = scalar_lea.vmem %s29_s27, 1024  ;;  %p428_p12 = scmp.lt.s32.totalorder %s29_s27, %s29_s27 }
  0x1b   :  { %p424_p11 = scmp.ne.s32.totalorder %s29_s27, %s423_s8  ;;  %p429_p13 = scmp.lt.s32.totalorder %s423_s8, %s423_s8 }
  0x1d   :  { %p430_p0 = por %p429_p13, %p428_p12 }
  0x1f   :  { %p431_p1 = pnand %p430_p0, %p424_p11 }
  0x21   :  { %434 = shalt.err (!%p431_p1)
}
  0x22   :  { %34 = dma.hbm_to_vmem [thread:$0]  %s537_s1, 1024, %s29_s27, [#allocation6], %s464_s22, %s464_s22, %s465_s23  }
  0x23   :  { %457 = dma.done.wait [#allocation3], 512  }
  0x24   :  { %458 = vsyncadd [#allocation3], 4294966784 }
  0x25   :  { %459 = dma.done.wait [#allocation6], 1024  }
  0x26   :  { %460 = vsyncadd [#allocation6], 4294966272  ;;  %v379_v0 = vld [vmem:[#allocation5] sm:$0xff]   ;;  %v380_v1 = vld [vmem:[#allocation5 + $0x8] sm:$0xff]   ;;  %s467_s11 = smov [#allocation7]  }
  0x27   :  { %334 = vmatprep.subr.bf16.mxu0 %v379_v0  ;;  %358 = vmatprep.subr.bf16.mxu1 %v379_v0  ;;  %v381_v2 = vld [vmem:[#allocation5 + $0x10] sm:$0xff]   ;;  %v382_v3 = vld [vmem:[#allocation5 + $0x18] sm:$0xff]   ;;  %v387_v4 = vld [vmem:[#allocation2] sm:$0xff]   ;;  %s257_s12 = sshll.u32 %s467_s11, 4  ;;  %s258_s12 = int_to_ptr.vmem [resolvable:$true] %s257_s12 }
  0x28   :  { %335 = vmatpush3.bf16.msra.mxu0 %v379_v0  ;;  %366 = vmatpush3.bf16.msra.mxu1 %v379_v0  ;;  %v388_v5 = vld [vmem:[#allocation2 + $0x10] sm:$0xff]   ;;  %v383_v6 = vld [vmem:[#allocation5 + $0x20] sm:$0xff]   ;;  %v384_v7 = vld [vmem:[#allocation5 + $0x28] sm:$0xff]   ;;  %p440_p3 = scmp.lt.s32.totalorder %s258_s12, %s258_s12 }
  0x29   :  { %336 = vmatprep.subr.bf16.mxu0 %v380_v1  ;;  %359 = vmatprep.subr.bf16.mxu1 %v380_v1  ;;  %v385_v8 = vld [vmem:[#allocation5 + $0x30] sm:$0xff]   ;;  %v386_v9 = vld [vmem:[#allocation5 + $0x38] sm:$0xff]   ;;  %v389_v10 = vld [vmem:[#allocation2 + $0x8] sm:$0xff]  }
  0x2a   :  { %350 = vmatprep.mubr.bf16.mxu0 %v387_v4  ;;  %354 = vmatprep.mubr.bf16.mxu1 %v388_v5  ;;  %v390_v11 = vld [vmem:[#allocation2 + $0x18] sm:$0xff]   ;;  %v270_v13 = vld [vmem:[%s538_s2] ss:$0 sm:$0xff]  ;;  %s435_s2 = scalar_lea.vmem %s258_s12, 512 }
  0x2b   :  { %p436_p2 = scmp.ne.s32.totalorder %s258_s12, %s435_s2  ;;  %p441_p4 = scmp.lt.s32.totalorder %s435_s2, %s435_s2 }
  0x2c   :  { %337 = vmatpush3.bf16.msra.mxu0 %v380_v1  ;;  %367 = vmatpush3.bf16.msra.mxu1 %v380_v1 }
  0x2d   :  { %338 = vmatprep.subr.bf16.mxu0 %v381_v2  ;;  %360 = vmatprep.subr.bf16.mxu1 %v381_v2  ;;  %p442_p5 = por %p441_p4, %p440_p3 }
  0x2f   :  { %p443_p6 = pnand %p442_p5, %p436_p2 }
  0x30   :  { %339 = vmatpush3.bf16.msra.mxu0 %v381_v2  ;;  %368 = vmatpush3.bf16.msra.mxu1 %v381_v2 }
  0x31   :  { %340 = vmatprep.subr.bf16.mxu0 %v382_v3  ;;  %361 = vmatprep.subr.bf16.mxu1 %v382_v3 }
  0x34   :  { %341 = vmatpush3.bf16.msra.mxu0 %v382_v3  ;;  %369 = vmatpush3.bf16.msra.mxu1 %v382_v3 }
  0x35   :  { %342 = vmatprep.subr.bf16.mxu0 %v383_v6  ;;  %362 = vmatprep.subr.bf16.mxu1 %v383_v6 }
  0x38   :  { %343 = vmatpush3.bf16.msra.mxu0 %v383_v6  ;;  %370 = vmatpush3.bf16.msra.mxu1 %v383_v6 }
  0x39   :  { %344 = vmatprep.subr.bf16.mxu0 %v384_v7  ;;  %363 = vmatprep.subr.bf16.mxu1 %v384_v7 }
  0x3c   :  { %345 = vmatpush3.bf16.msra.mxu0 %v384_v7  ;;  %371 = vmatpush3.bf16.msra.mxu1 %v384_v7 }
  0x3d   :  { %346 = vmatprep.subr.bf16.mxu0 %v385_v8  ;;  %364 = vmatprep.subr.bf16.mxu1 %v385_v8 }
  0x40   :  { %347 = vmatpush3.bf16.msra.mxu0 %v385_v8  ;;  %372 = vmatpush3.bf16.msra.mxu1 %v385_v8 }
  0x41   :  { %348 = vmatprep.subr.bf16.mxu0 %v386_v9  ;;  %365 = vmatprep.subr.bf16.mxu1 %v386_v9 }
  0x44   :  { %349 = vmatpush3.bf16.msra.mxu0 %v386_v9  ;;  %373 = vmatpush3.bf16.msra.mxu1 %v386_v9 }
  0x47   :  { %351 = vmatmul.mubr.bf16.vlgmr.msra.gmra.mrb[0].mxu0 %v389_v10  ;;  %355 = vmatmul.mubr.bf16.vlgmr.msra.gmra.mrb[0].mxu1 %v390_v11 }
 0x11a   :  { %v352_v12 = vpop.f32.mrb[0].mxu0  ;;  %v356_v14 = vpop.f32.mrb[0].mxu1 }
 0x11b   :  { %v181_v15 = vpop.f32.mrb[1].mxu0  ;;  %v197_v16 = vpop.f32.mrb[1].mxu1  ;;  %v190_v19 = vadd.f32 %v352_v12, %v270_v13  ;;  %v206_v20 = vadd.f32 %v356_v14, %v270_v13 }
 0x11c   :  { %v353_v17 = vpop.f32.mrb[2].mxu0  ;;  %v357_v18 = vpop.f32.mrb[2].mxu1  ;;  %v182_v25 = vadd.f32 %v270_v13, %v181_v15  ;;  %v198_v26 = vadd.f32 %v270_v13, %v197_v16 }
 0x11d   :  { %v193_v21 = vadd.f32 %v353_v17, %v270_v13  ;;  %v209_v22 = vadd.f32 %v357_v18, %v270_v13  ;;  %v184_v23 = vpop.f32.mrb[3].mxu0  ;;  %v200_v24 = vpop.f32.mrb[3].mxu1 }
 0x11e   :  { %v185_v27 = vadd.f32 %v270_v13, %v184_v23  ;;  %v201_v28 = vadd.f32 %v270_v13, %v200_v24 }
 0x11f   :  { %v307_v29 = vpack.c.bf16 %v193_v21, %v190_v19  ;;  %v317_v30 = vpack.c.bf16 %v209_v22, %v206_v20 }
 0x120   :  { %v302_v31 = vpack.c.bf16 %v185_v27, %v182_v25  ;;  %v312_v32 = vpack.c.bf16 %v201_v28, %v198_v26 }
 0x121   :  { %319 = vst [vmem:[#allocation7 + $0x8] sm:$0xff] %v307_v29   ;;  %321 = vst [vmem:[#allocation7 + $0x18] sm:$0xff] %v317_v30  }
 0x122   :  { %303 = vst [vmem:[#allocation7] sm:$0xff] %v302_v31   ;;  %320 = vst [vmem:[#allocation7 + $0x10] sm:$0xff] %v312_v32  }
 0x123   :  { %446 = shalt.err (!%p443_p6)
}
 0x124   :  { %s447_s15 = scalar_lea.hbm %s539_s3, 512 }
 0x125   :  { %p448_p7 = scmp.ne.s32.totalorder %s539_s3, %s447_s15  ;;  %p451_p8 = scmp.lt.u32.totalorder %s447_s15, %s539_s3 }
 0x127   :  { %p453_p9 = pnand %p451_p8, %p448_p7 }
 0x129   :  { %456 = shalt.err (!%p453_p9)
}
 0x12a   :  { %263 = dma.vmem_to_hbm [thread:$0]  %s258_s12, 512, %s539_s3, [#allocation4], %s464_s22, %s464_s22, %s465_s23  }
 0x12b   :  { %461 = dma.done.wait [#allocation4], 512  }
 0x12c   :  { %462 = vsyncadd [#allocation4], 4294966784 }
 0x12d   :  { %267 = vsyncpa [#allocation3], 1 }
 0x12e   :  { %268 = vsyncpa [#allocation6], 1 }
 0x12f   :  { %269 = vsyncpa [#allocation4], 1 }

</bundles_post_ra>
